<compile_context>
chip_gen: v6e
topology: v6e:2x2x1
jax: 0.10.0
libtpu: 0.0.40
codegen_flags: <defaults>
</compile_context>

<pallas_src>
import jax
import jax.numpy as jnp
from jax.experimental import pallas as pl
from jax.experimental.pallas import tpu as pltpu


def _detection_head_kernel(x_ref, wc_ref, bc_ref, wb_ref, bb_ref,
                           cls_ref, box_ref):
    # x_ref:   (C, TN)      one batch's spatial tile, channels in sublanes
    # wc_ref:  (n_cls, C)   resident cls 1x1-conv weight
    # bc_ref:  (n_cls, 1)   cls bias (broadcast over lanes)
    # wb_ref:  (n_box, C)   resident box 1x1-conv weight
    # bb_ref:  (n_box, 1)   box bias
    # cls_ref: (n_cls, TN)  lane-dense cls output tile
    # box_ref: (n_box, TN)  lane-dense box output tile
    x = x_ref[...]
    cls_ref[...] = (
        jnp.dot(wc_ref[...], x, preferred_element_type=jnp.float32)
        + bc_ref[...]
    ).astype(cls_ref.dtype)
    box_ref[...] = (
        jnp.dot(wb_ref[...], x, preferred_element_type=jnp.float32)
        + bb_ref[...]
    ).astype(box_ref.dtype)


def _round_down(v, m):
    return (v // m) * m


def _round_up(v, m):
    return ((v + m - 1) // m) * m


def detection_head_forward(x, w_cls, b_cls, w_box, b_box, *, tile_n=4096):
    """1x1-conv detection head (== PyTorch DetectionHead.forward).

    x:      (B, C, H, W)  feature map (NCHW, as in PyTorch)
    w_cls:  (n_cls, C)    == cls_head.weight[:, :, 0, 0]
    b_cls:  (n_cls,)
    w_box:  (n_box, C)    == box_head.weight[:, :, 0, 0]
    b_box:  (n_box,)
    Returns {'cls_preds': (B, n_cls, H, W), 'box_preds': (B, n_box, H, W)}.
    Works for fp32 or bf16 activations/weights unchanged (accumulates in f32).
    """
    B, C, H, W = x.shape
    n_cls = w_cls.shape[0]
    n_box = w_box.shape[0]
    N = H * W
    lane = 128
    itemsize = jnp.dtype(x.dtype).itemsize

    # ---- spatial (lane) tile, sized from this generation's VMEM budget ----
    try:
        vmem_bytes = int(pltpu.get_tpu_info().vmem_capacity_bytes)
    except Exception:  # non-TPU backend / attribute mismatch: conservative
        vmem_bytes = 64 * 1024 * 1024
    budget = vmem_bytes // 2  # keep <= half of VMEM for this call
    # Per lane column: double-buffered x tile + double-buffered cls/box tiles.
    per_col = 2 * (C + n_cls + n_box) * itemsize
    tn = min(tile_n, max(lane, budget // per_col), _round_up(N, lane))
    tn = max(lane, _round_down(tn, lane))

    # v7x megacore: make sure both TensorCores get work (>= 2 grid programs).
    while B * pl.cdiv(N, tn) < 2 and tn > lane:
        tn = max(lane, _round_down(tn // 2, lane))

    grid = (B, pl.cdiv(N, tn))

    # NCHW -> (B, C, H*W): pure reshape, no padding pass over x.
    x_flat = x.reshape(B, C, N)
    bc = b_cls.reshape(n_cls, 1)
    bb = b_box.reshape(n_box, 1)

    weight_bytes = int(
        (w_cls.size + b_cls.size + w_box.size + b_box.size) * itemsize)
    cost = pl.CostEstimate(
        flops=2 * B * N * (n_cls + n_box) * C,
        transcendentals=0,
        bytes_accessed=int(B * N * (C + n_cls + n_box) * itemsize)
        + weight_bytes,
    )

    # NOTE: on v5e/v6e (128 MiB VMEM) one could additionally deepen buffering
    # on the x stream (pipeline_mode=pl.Buffered(3)); default 2-deep is kept
    # here so the same code is VMEM-safe on v7x.
    cls_out, box_out = pl.pallas_call(
        _detection_head_kernel,
        out_shape=(
            jax.ShapeDtypeStruct((B, n_cls, N), x.dtype),
            jax.ShapeDtypeStruct((B, n_box, N), x.dtype),
        ),
        grid_spec=pltpu.PrefetchScalarGridSpec(
            num_scalar_prefetch=0,
            grid=grid,
            in_specs=[
                # x tile: batch squeezed, full channel extent, lane-dense tile
                pl.BlockSpec((None, C, tn), lambda b, j: (b, 0, j)),
                # resident weights / biases (constant index maps)
                pl.BlockSpec((n_cls, C), lambda b, j: (0, 0)),
                pl.BlockSpec((n_cls, 1), lambda b, j: (0, 0)),
                pl.BlockSpec((n_box, C), lambda b, j: (0, 0)),
                pl.BlockSpec((n_box, 1), lambda b, j: (0, 0)),
            ],
            out_specs=[
                pl.BlockSpec((None, n_cls, tn), lambda b, j: (b, 0, j)),
                pl.BlockSpec((None, n_box, tn), lambda b, j: (b, 0, j)),
            ],
        ),
        compiler_params=pltpu.CompilerParams(
            dimension_semantics=("parallel", "parallel"),
            vmem_limit_bytes=int(budget),
        ),
        cost_estimate=cost,
    )(x_flat, w_cls, bc, w_box, bb)

    # Back to NCHW: pure views, no slicing / copy kernels.
    return {
        "cls_preds": cls_out.reshape(B, n_cls, H, W),
        "box_preds": box_out.reshape(B, n_box, H, W),
    }


if __name__ == "__main__":
    # Small shapes consistent with the module.
    B, C, H, W = 2, 4, 16, 16
    num_classes, num_anchors = 3, 2
    n_cls = num_anchors * num_classes   # 6
    n_box = num_anchors * 7             # 14

    key = jax.random.PRNGKey(0)
    kx, kwc, kbc, kwb, kbb = jax.random.split(key, 5)

    x = jax.random.normal(kx, (B, C, H, W), dtype=jnp.float32)
    # 1x1 conv weights stored as (C_out, C_in) (== PyTorch conv weight
    # squeezed), biases as (C_out,).
    w_cls = jax.random.normal(kwc, (n_cls, C), dtype=jnp.float32) * 0.1
    b_cls = jax.random.normal(kbc, (n_cls,), dtype=jnp.float32) * 0.1
    w_box = jax.random.normal(kwb, (n_box, C), dtype=jnp.float32) * 0.1
    b_box = jax.random.normal(kbb, (n_box,), dtype=jnp.float32) * 0.1

    out = detection_head_forward(x, w_cls, b_cls, w_box, b_box)
    jax.block_until_ready(out)

    # Pure-JAX reference: 1x1 conv == per-pixel matmul.
    def ref(x, w, b):
        return jnp.einsum("bchw,nc->bnhw", x, w) + b[None, :, None, None]

    assert out["cls_preds"].shape == (B, n_cls, H, W)
    assert out["box_preds"].shape == (B, n_box, H, W)
    assert jnp.allclose(out["cls_preds"], ref(x, w_cls, b_cls), atol=1e-5)
    assert jnp.allclose(out["box_preds"], ref(x, w_box, b_box), atol=1e-5)

    print("KERNEL_OK")
</pallas_src>

<mosaic_0001>
module attributes {stable_mosaic.version = 11 : i64} {
  func.func @_detection_head_kernel(%arg0: i32, %arg1: i32, %arg2: memref<1x4x256xf32, #tpu.memory_space<vmem>>, %arg3: memref<6x4xf32, #tpu.memory_space<vmem>>, %arg4: memref<6x1xf32, #tpu.memory_space<vmem>>, %arg5: memref<14x4xf32, #tpu.memory_space<vmem>>, %arg6: memref<14x1xf32, #tpu.memory_space<vmem>>, %arg7: memref<1x6x256xf32, #tpu.memory_space<vmem>>, %arg8: memref<1x14x256xf32, #tpu.memory_space<vmem>>) attributes {dimension_semantics = [#tpu.dimension_semantics<parallel>, #tpu.dimension_semantics<parallel>], iteration_bounds = array<i64: 2, 1>, scalar_prefetch = 0 : i64, scratch_operands = 0 : i64, tpu.core_type = #tpu.core_type<tc>, window_params = [{transform_indices = @transform_0, window_bounds = array<i64: 1, 4, 256>}, {pipeline_mode = #tpu.pipeline_mode<synchronous>, transform_indices = @transform_1, window_bounds = array<i64: 6, 4>}, {pipeline_mode = #tpu.pipeline_mode<synchronous>, transform_indices = @transform_2, window_bounds = array<i64: 6, 1>}, {pipeline_mode = #tpu.pipeline_mode<synchronous>, transform_indices = @transform_3, window_bounds = array<i64: 14, 4>}, {pipeline_mode = #tpu.pipeline_mode<synchronous>, transform_indices = @transform_4, window_bounds = array<i64: 14, 1>}, {transform_indices = @transform_5, window_bounds = array<i64: 1, 6, 256>}, {transform_indices = @transform_6, window_bounds = array<i64: 1, 14, 256>}]} {
    %c0 = arith.constant 0 : index
    %c0_0 = arith.constant 0 : index
    %c0_1 = arith.constant 0 : index
    %0 = vector.load %arg2[%c0, %c0_0, %c0_1] : memref<1x4x256xf32, #tpu.memory_space<vmem>>, vector<1x4x256xf32>
    %1 = vector.shape_cast %0 : vector<1x4x256xf32> to vector<4x256xf32>
    %c0_2 = arith.constant 0 : index
    %c0_3 = arith.constant 0 : index
    %2 = vector.load %arg3[%c0_2, %c0_3] : memref<6x4xf32, #tpu.memory_space<vmem>>, vector<6x4xf32>
    %cst = arith.constant dense<0.000000e+00> : vector<6x256xf32>
    %3 = tpu.matmul %2, %1, %cst {dimension_numbers = #tpu.dot_dimension_numbers<[1], [0], [0], [1], [0, 0, 1, 1], [], []>} : vector<6x4xf32>, vector<4x256xf32>, vector<6x256xf32> -> vector<6x256xf32>
    %c0_4 = arith.constant 0 : index
    %c0_5 = arith.constant 0 : index
    %4 = vector.load %arg4[%c0_4, %c0_5] : memref<6x1xf32, #tpu.memory_space<vmem>>, vector<6x1xf32>
    %5 = vector.broadcast %4 : vector<6x1xf32> to vector<6x256xf32>
    %6 = arith.addf %3, %5 : vector<6x256xf32>
    %c0_6 = arith.constant 0 : index
    %c0_7 = arith.constant 0 : index
    %c0_8 = arith.constant 0 : index
    %7 = vector.load %arg7[%c0_6, %c0_7, %c0_8] : memref<1x6x256xf32, #tpu.memory_space<vmem>>, vector<1x6x256xf32>
    %8 = vector.shape_cast %7 : vector<1x6x256xf32> to vector<6x256xf32>
    %9 = vector.shape_cast %6 : vector<6x256xf32> to vector<1x6x256xf32>
    tpu.vector_store %arg7[%c0_6, %c0_7, %c0_8], %9 {strides = array<i32>} : memref<1x6x256xf32, #tpu.memory_space<vmem>>, vector<1x6x256xf32>,
    %c0_9 = arith.constant 0 : index
    %c0_10 = arith.constant 0 : index
    %10 = vector.load %arg5[%c0_9, %c0_10] : memref<14x4xf32, #tpu.memory_space<vmem>>, vector<14x4xf32>
    %cst_11 = arith.constant dense<0.000000e+00> : vector<14x256xf32>
    %11 = tpu.matmul %10, %1, %cst_11 {dimension_numbers = #tpu.dot_dimension_numbers<[1], [0], [0], [1], [0, 0, 1, 1], [], []>} : vector<14x4xf32>, vector<4x256xf32>, vector<14x256xf32> -> vector<14x256xf32>
    %c0_12 = arith.constant 0 : index
    %c0_13 = arith.constant 0 : index
    %12 = vector.load %arg6[%c0_12, %c0_13] : memref<14x1xf32, #tpu.memory_space<vmem>>, vector<14x1xf32>
    %13 = vector.broadcast %12 : vector<14x1xf32> to vector<14x256xf32>
    %14 = arith.addf %11, %13 : vector<14x256xf32>
    %c0_14 = arith.constant 0 : index
    %c0_15 = arith.constant 0 : index
    %c0_16 = arith.constant 0 : index
    %15 = vector.load %arg8[%c0_14, %c0_15, %c0_16] : memref<1x14x256xf32, #tpu.memory_space<vmem>>, vector<1x14x256xf32>
    %16 = vector.shape_cast %15 : vector<1x14x256xf32> to vector<14x256xf32>
    %17 = vector.shape_cast %14 : vector<14x256xf32> to vector<1x14x256xf32>
    tpu.vector_store %arg8[%c0_14, %c0_15, %c0_16], %17 {strides = array<i32>} : memref<1x14x256xf32, #tpu.memory_space<vmem>>, vector<1x14x256xf32>,
    return
  }
  func.func @transform_0(%arg0: i32, %arg1: i32) -> (i32, i32, i32) {
    %c0_i32 = arith.constant 0 : i32
    %c0_i32_0 = arith.constant 0 : i32
    return %arg0, %c0_i32, %arg1 : i32, i32, i32
  }
  func.func @transform_1(%arg0: i32, %arg1: i32) -> (i32, i32) {
    %c0_i32 = arith.constant 0 : i32
    %c0_i32_0 = arith.constant 0 : i32
    %c0_i32_1 = arith.constant 0 : i32
    return %c0_i32, %c0_i32_0 : i32, i32
  }
  func.func @transform_2(%arg0: i32, %arg1: i32) -> (i32, i32) {
    %c0_i32 = arith.constant 0 : i32
    %c0_i32_0 = arith.constant 0 : i32
    %c0_i32_1 = arith.constant 0 : i32
    return %c0_i32, %c0_i32_0 : i32, i32
  }
  func.func @transform_3(%arg0: i32, %arg1: i32) -> (i32, i32) {
    %c0_i32 = arith.constant 0 : i32
    %c0_i32_0 = arith.constant 0 : i32
    %c0_i32_1 = arith.constant 0 : i32
    return %c0_i32, %c0_i32_0 : i32, i32
  }
  func.func @transform_4(%arg0: i32, %arg1: i32) -> (i32, i32) {
    %c0_i32 = arith.constant 0 : i32
    %c0_i32_0 = arith.constant 0 : i32
    %c0_i32_1 = arith.constant 0 : i32
    return %c0_i32, %c0_i32_0 : i32, i32
  }
  func.func @transform_5(%arg0: i32, %arg1: i32) -> (i32, i32, i32) {
    %c0_i32 = arith.constant 0 : i32
    %c0_i32_0 = arith.constant 0 : i32
    return %arg0, %c0_i32, %arg1 : i32, i32, i32
  }
  func.func @transform_6(%arg0: i32, %arg1: i32) -> (i32, i32, i32) {
    %c0_i32 = arith.constant 0 : i32
    %c0_i32_0 = arith.constant 0 : i32
    return %arg0, %c0_i32, %arg1 : i32, i32, i32
  }
}

</mosaic_0001>

<bundles_post_ra>
// kernel: tpu_custom_call.1
= control target key start
LH: loop header
LB: loop body
LE: loop exit
PB: predicated region body
PF: predicated region fallthrough
CT: control target
= control target key end

     0   :  { %s758_s21 = smov 0   ;;  %s760_s22 = smov 0   ;;  %s817_s0 = inlined_call_operand.vmem [shape: f32[2,4,256], index: 0, kind: input, shape index: {}]   ;;  %s818_s1 = inlined_call_operand.vmem [shape: f32[6,4], index: 1, kind: input, shape index: {}]   ;;  %s819_s2 = inlined_call_operand.vmem [shape: f32[6,1], index: 2, kind: input, shape index: {}]   ;;  %s820_s3 = inlined_call_operand.vmem [shape: f32[14,4], index: 3, kind: input, shape index: {}]   ;;  %s821_s4 = inlined_call_operand.vmem [shape: f32[14,1], index: 4, kind: input, shape index: {}]   ;;  %s822_s5 = inlined_call_operand.vmem [shape: f32[2,6,256], index: 5, kind: output, shape index: {0}]   ;;  %s823_s6 = inlined_call_operand.vmem [shape: f32[2,14,256], index: 6, kind: output, shape index: {1}]  }
   0x1   :  { %s762_s23 = smov 0  }
   0x2 LB: > { %s29_s24 = sadd.s32 1, %s715_s22  ;;  %p649_p0 = scmp.ge.s32.totalorder %s719_s23, 1  ;;  %s719_s23 = sphi %s762_s23, %s17_s23   ;;  %s715_s22 = sphi %s760_s22, %s825_s22   ;;  %s711_s21 = sphi %s758_s21, %s824_s21  }
   0x3   : > { %p31_p1 = scmp.ge.s32.totalorder %s29_s24, 2  ;;  %p238_p2 = scmp.lt.s32.totalorder %s719_s23, 3 }
   0x5   : > { %s827_s24 = smov (%p31_p1, %s29_s24), 0  ;;  %p239_p3 = pnand %p649_p0, %p238_p2 }
   0x6   : > { %p286_p4 = scmp.lt.s32.totalorder (!%p239_p3), %s711_s21, 1 }
   0x7   : > { %242 = sbr.rel (%p239_p3) target bundleno = 223 (0xdf), region = 40 }
   0xc   : > { %v721_v0 = vmov 0.0   ;;  %v317_v1 = vld [vmem:[%s819_s2] sm:$0x3f]  ;;  %s829_s21 = smov (!%p286_p4, %s711_s21), 1  ;;  %v722_v2 = vmov 0   ;;  %vm329_vm0 = vcmask 1043456  }
   0xd   : > { %398 = vmatprep.mubr.f32.mxu0 %v721_v0  ;;  %491 = vmatprep.mubr.f32.mxu1 %v721_v0  ;;  %v410_v3 = vld [vmem:[%s821_s4 + $0x8] sm:$0x3f]  ;;  %s665_s29 = sshll.u32 %s829_s21, 3  ;;  %v409_v4 = vld [vmem:[%s821_s4] sm:$0xff]  ;;  %vm325_vm1 = vcmask 31744   ;;  %s666_s17 = sshll.u32 %s829_s21, 4 }
   0xe   : > { %694 = vset.pattern.permute.xlu0 %v722_v2  ;;  %695 = vset.pattern.permute.xlu1 %v722_v2  ;;  %s293_s10 = scalar_lea.vmem %s817_s0, %s665_s29  ;;  %v316_v7 = vld [vmem:[%s818_s1] sm:$0x3f]  ;;  %v408_v9 = vld [vmem:[%s820_s3 + $0x8] sm:$0x3f]  ;;  %s667_s18 = sshll.u32 %s829_s21, 5 }
   0xf   : > { %320 = vperm.xlu0 %694, %v317_v1   ;;  %418 = vperm.xlu1 %695, %v410_v3   ;;  %v315_v5 = vld [vmem:[%s293_s10] sm:$0xff]  ;;  %s303_s25 = scalar_lea.vmem %s822_s5, %s666_s17  ;;  %s313_s28 = scalar_lea.vmem %s823_s6, %s667_s18 }
  0x10   : > { %v324_v6 = vcombine.high %v315_v5, %v315_v5  ;;  %v407_v8 = vld [vmem:[%s820_s3] sm:$0xff] }
  0x12   : > { %656 = vmatprep.subr.msk.mxu0 %vm329_vm0, %v324_v6  ;;  %659 = vmatprep.subr.msk.mxu1 %vm329_vm0, %v324_v6 }
  0x13   : > { %413 = vperm.xlu0 %694, %v409_v4   ;;  %657 = vmatpush1.msk.msra.mxu0 %vm329_vm0, %v315_v5 }
  0x14   : > { %660 = vmatpush1.msk.msra.mxu1 %vm329_vm0, %v315_v5  ;;  %658 = vmatmul.mubr.msk.f32.vlgmr.msra.gmra.mxu0 %vm325_vm1, %v316_v7 }
  0x15   : > { %661 = vmatmul.mubr.msk.f32.vlgmr.msra.gmra.mxu1 %vm325_vm1, %v407_v8 }
  0x16   : > { %497 = vmatprep.mubr.f32.mxu1 %v721_v0 }
  0x19   : > { %662 = vmatmul.mubr.msk.f32.gmra.mxu1 %vm325_vm1, %v408_v9 }
  0x8a   : > { %v321_v10 = vpop.permute.xlu0 %320  ;;  %v419_v16 = vpop.permute.xlu1 %418 }
  0x8e   : > { %v414_v11 = vpop.permute.xlu0 %413 }
  0xd4   : > { %v400_v12 = vpop.f32.mrf.mxu0 }
  0xd5   : > { %v493_v13 = vpop.f32.mrf.mxu1  ;;  %v401_v14 = vadd.f32 %v400_v12, %v321_v10 }
  0xd6   : > { %v494_v15 = vadd.f32 %v493_v13, %v414_v11  ;;  %v402_v17 = vpop.f32.mrf.mxu0 }
  0xd7   : > { %v495_v18 = vpop.f32.mrf.mxu1  ;;  %405 = vst [vmem:[%s303_s25] sm:$0x3f] %v401_v14  ;;  %v403_v19 = vadd.f32 %v402_v17, %v321_v10 }
  0xd8   : > { %504 = vst [vmem:[%s313_s28] sm:$0xff] %v494_v15  ;;  %v496_v20 = vadd.f32 %v495_v18, %v414_v11 }
  0xd9   : > { %v499_v21 = vpop.f32.mrf.mxu1  ;;  %406 = vst [vmem:[%s303_s25 + $0x8] sm:$0x3f] %v403_v19 }
  0xda   : > { %505 = vst [vmem:[%s313_s28 + $0x8] sm:$0xff] %v496_v20  ;;  %v500_v22 = vadd.f32 %v499_v21, %v419_v16 }
  0xdb   : > { %v501_v23 = vpop.f32.mrf.mxu1 }
  0xdc   : > { %506 = vst [vmem:[%s313_s28 + $0x10] sm:$0x3f] %v500_v22  ;;  %v502_v24 = vadd.f32 %v501_v23, %v419_v16 }
  0xde   : > { %507 = vst [vmem:[%s313_s28 + $0x18] sm:$0x3f] %v502_v24 }
  0xdf PF: > { %s17_s23 = sadd.s32 1, %s719_s23   ;;  %s824_s21 = smov %s715_s22 }
  0xe0   : > { %p14_p5 = scmp.ge.s32.totalorder %s17_s23, 4   ;;  %s825_s22 = smov %s827_s24 }
  0xe2   :  { %16 = sbr.rel (!%p14_p5) target bundleno = 2 (0x2), region = 82 }

</bundles_post_ra>
